<compile_context>
chip_gen: v7x
topology: tpu7x:2x2x1
jax: 0.10.0
libtpu: 0.0.40
codegen_flags: <defaults>
</compile_context>

<pallas_src>
import functools

import jax
import jax.numpy as jnp
from jax.experimental import pallas as pl
from jax.experimental.pallas import tpu as pltpu


def _band_pad_kernel(x_ref, o_ref, *, lo, size):
    """Copy x into o at offset `lo` along axis 1; zero-fill both pad bands.

    Works for the 2-D (nb, C*HW) -> (nb, C_out*HW) flattened, lane-dense path
    and for the 3-D (nb, C, HW) -> (nb, C_out, HW) fallback path.
    """
    lead = o_ref.shape[:1]
    tail = o_ref.shape[2:]
    total = o_ref.shape[1]
    if lo > 0:                                       # leading zero channels
        o_ref[:, :lo] = jnp.zeros(lead + (lo,) + tail, o_ref.dtype)
    o_ref[:, lo:lo + size] = x_ref[...].astype(o_ref.dtype)
    if lo + size < total:                            # trailing zero channels
        o_ref[:, lo + size:] = jnp.zeros(lead + (total - lo - size,) + tail, o_ref.dtype)


def _tpu_params():
    """Per-generation tuning: (target out-bytes/step, tensorcores/chip,
    default scoped-VMEM bytes, safe VMEM cap)."""
    mib = 1 << 20
    kind = ""
    try:
        kind = jax.devices()[0].device_kind.lower()
    except Exception:
        pass
    if "v5 lite" in kind or "v5e" in kind or "v5lite" in kind:
        return 2 * mib, 1, 16 * mib, 96 * mib        # v5e: small scoped-VMEM default
    if "v6" in kind:
        return 3 * mib, 1, 32 * mib, 96 * mib        # v6e: 1 TC, 128 MiB physical VMEM
    if "v7" in kind or "7x" in kind:
        return 4 * mib, 2, 32 * mib, 48 * mib        # v7x: 2 TCs, only 64 MiB physical
    return 2 * mib, 1, 16 * mib, 48 * mib            # unknown / v4 / v5p: conservative


def _pick_batch_block(n, out_row_bytes, itemsize, target_bytes, num_cores):
    """Batch rows per grid step: multi-MiB blocks amortize the ~0.35 us/step
    pipeline overhead, blocks are sublane-aligned (multiple of 8/16/32 or == N),
    and the grid is split across cores only when each core gets real traffic."""
    sub = 8 * max(1, 4 // max(itemsize, 1))          # 8 f32 / 16 bf16 / 32 int8
    nb = max(1, int(target_bytes) // max(int(out_row_bytes), 1))
    if num_cores > 1 and n * out_row_bytes >= (2 << 20):
        nb = min(nb, -(-n // num_cores))             # ceil(n / num_cores)
    nb = min(nb, n)
    if nb < n:
        nb = (nb // sub) * sub
        if nb == 0:
            nb = min(n, sub)
    return int(nb)


def _round_up(a, b):
    return -(-a // b) * b


@functools.partial(jax.jit, static_argnums=(1,))
def lambda_layer(x: jax.Array, planes: int) -> jax.Array:
    """Pallas implementation of LambdaLayer with the option-A shortcut lambda."""
    N, C, H, W = x.shape
    pad = planes // 4
    C_out = C + 2 * pad
    itemsize = jnp.dtype(x.dtype).itemsize

    # Stride-2 spatial decimation (matches x[:, :, ::2, ::2], incl. odd H/W).
    # It stays an XLA producer but is allowed to fuse into the pallas_call
    # operand (allow_input_fusion), so no standalone decimated array needs to
    # round-trip HBM.
    xs = x[:, :, ::2, ::2]
    Ho, Wo = xs.shape[2], xs.shape[3]
    HW = Ho * Wo

    target_bytes, num_cores, default_vmem, vmem_cap = _tpu_params()
    out_row_bytes = C_out * HW * itemsize
    nb = _pick_batch_block(N, out_row_bytes, itemsize, target_bytes, num_cores)
    grid = (pl.cdiv(N, nb),)

    # Output presentation: flattened lane-dense rows only if the band seams
    # (pad*HW and (pad+C)*HW) sit on 128-lane boundaries; otherwise keep the
    # channel axis separate with HW as the full last dim.
    lo_flat = pad * HW
    flat = (lo_flat % 128 == 0) and ((C * HW) % 128 == 0)
    if flat:
        x_in = xs.reshape(N, C * HW)
        in_spec = pl.BlockSpec((nb, C * HW), lambda n: (n, 0))
        out_struct = jax.ShapeDtypeStruct((N, C_out * HW), x.dtype)
        out_spec = pl.BlockSpec((nb, C_out * HW), lambda n: (n, 0))
        lo, size = lo_flat, C * HW
        in_blk = _round_up(nb, 8) * _round_up(C * HW, 128) * itemsize
        out_blk = _round_up(nb, 8) * _round_up(C_out * HW, 128) * itemsize
    else:
        x_in = xs.reshape(N, C, HW)
        in_spec = pl.BlockSpec((nb, C, HW), lambda n: (n, 0, 0))
        out_struct = jax.ShapeDtypeStruct((N, C_out, HW), x.dtype)
        out_spec = pl.BlockSpec((nb, C_out, HW), lambda n: (n, 0, 0))
        lo, size = pad, C
        in_blk = nb * _round_up(C, 8) * _round_up(HW, 128) * itemsize
        out_blk = nb * _round_up(C_out, 8) * _round_up(HW, 128) * itemsize

    # Raise the scoped-VMEM limit only when the double-buffered blocks would
    # not fit this generation's default limit.
    est_vmem = 2 * (in_blk + out_blk)
    cp = dict(dimension_semantics=("parallel",), allow_input_fusion=[True])
    if est_vmem > (default_vmem * 3) // 4:
        # TODO(synk): feature maps so large that a single batch row exceeds the
        # VMEM cap would additionally need the lane axis tiled.
        cp["vmem_limit_bytes"] = int(min(vmem_cap, max(default_vmem, (est_vmem * 3) // 2)))

    read_bytes = N * C * HW * itemsize
    write_bytes = N * C_out * HW * itemsize

    out = pl.pallas_call(
        functools.partial(_band_pad_kernel, lo=lo, size=size),
        out_shape=out_struct,
        grid=grid,
        in_specs=[in_spec],
        out_specs=out_spec,
        compiler_params=pltpu.CompilerParams(**cp),
        cost_estimate=pl.CostEstimate(
            flops=0, transcendentals=0,
            bytes_accessed=int(read_bytes + write_bytes)),
    )(x_in)

    return out.reshape(N, C_out, Ho, Wo)


if __name__ == "__main__":
    key = jax.random.PRNGKey(0)
    # Small NCHW input consistent with the module's usage in a CIFAR ResNet block.
    N, C, H, W = 2, 4, 16, 16
    planes = 2 * C              # the block doubles the channels; pad = planes // 4 = 2
    x = jax.random.normal(key, (N, C, H, W), dtype=jnp.float32)

    out = jax.block_until_ready(lambda_layer(x, planes))

    # Pure-JAX reference of the same lambda.
    pad = planes // 4
    ref = jnp.pad(x[:, :, ::2, ::2], ((0, 0), (pad, pad), (0, 0), (0, 0)))
    assert out.shape == (N, C + 2 * pad, H // 2, W // 2), out.shape
    assert jnp.array_equal(out, ref)

    print("KERNEL_OK")
</pallas_src>

<mosaic_0001>
module attributes {stable_mosaic.version = 11 : i64} {
  func.func @_band_pad_kernel(%arg0: i32, %arg1: memref<2x256xf32, #tpu.memory_space<vmem>>, %arg2: memref<2x512xf32, #tpu.memory_space<vmem>>) attributes {dimension_semantics = [#tpu.dimension_semantics<parallel>], iteration_bounds = array<i64: 1>, scalar_prefetch = 0 : i64, scratch_operands = 0 : i64, tpu.core_type = #tpu.core_type<tc>, window_params = [{transform_indices = @transform_0, window_bounds = array<i64: 2, 256>}, {transform_indices = @transform_1, window_bounds = array<i64: 2, 512>}]} {
    %cst = arith.constant 0.000000e+00 : f32
    %0 = vector.broadcast %cst : f32 to vector<2x128xf32>
    %c0 = arith.constant 0 : index
    %c0_0 = arith.constant 0 : index
    %1 = vector.load %arg2[%c0, %c0_0] : memref<2x512xf32, #tpu.memory_space<vmem>>, vector<2x128xf32>
    tpu.vector_store %arg2[%c0, %c0_0], %0 {strides = array<i32>} : memref<2x512xf32, #tpu.memory_space<vmem>>, vector<2x128xf32>,
    %c0_1 = arith.constant 0 : index
    %c0_2 = arith.constant 0 : index
    %2 = vector.load %arg1[%c0_1, %c0_2] : memref<2x256xf32, #tpu.memory_space<vmem>>, vector<2x256xf32>
    %c0_3 = arith.constant 0 : index
    %c128 = arith.constant 128 : index
    %3 = vector.load %arg2[%c0_3, %c128] : memref<2x512xf32, #tpu.memory_space<vmem>>, vector<2x256xf32>
    tpu.vector_store %arg2[%c0_3, %c128], %2 {strides = array<i32>} : memref<2x512xf32, #tpu.memory_space<vmem>>, vector<2x256xf32>,
    %cst_4 = arith.constant 0.000000e+00 : f32
    %4 = vector.broadcast %cst_4 : f32 to vector<2x128xf32>
    %c0_5 = arith.constant 0 : index
    %c384 = arith.constant 384 : index
    %5 = vector.load %arg2[%c0_5, %c384] : memref<2x512xf32, #tpu.memory_space<vmem>>, vector<2x128xf32>
    tpu.vector_store %arg2[%c0_5, %c384], %4 {strides = array<i32>} : memref<2x512xf32, #tpu.memory_space<vmem>>, vector<2x128xf32>,
    return
  }
  func.func @transform_0(%arg0: i32) -> (i32, i32) {
    %c0_i32 = arith.constant 0 : i32
    %c0_i32_0 = arith.constant 0 : i32
    return %arg0, %c0_i32 : i32, i32
  }
  func.func @transform_1(%arg0: i32) -> (i32, i32) {
    %c0_i32 = arith.constant 0 : i32
    %c0_i32_0 = arith.constant 0 : i32
    return %arg0, %c0_i32 : i32, i32
  }
}

</mosaic_0001>

<bundles_post_ra>
// kernel: lambda_layer.1
= control target key start
LH: loop header
LB: loop body
LE: loop exit
PB: predicated region body
PF: predicated region fallthrough
CT: control target
= control target key end

     0   :  { %v17_v0 = vmov 0.0   ;;  %s40_s1 = inlined_call_operand.vmem [shape: f32[2,512], index: 1, kind: output, shape index: {}]   ;;  %s41_s0 = inlined_call_operand.vmem [shape: f32[2,256], index: 0, kind: input, shape index: {}]  }
   0x1   :  { %8 = vst [vmem:[%s40_s1] sm:$0x3] %v17_v0  ;;  %11 = vst [vmem:[%s40_s1 + $0x6] sm:$0x3] %v17_v0  ;;  %v9_v1 = vld [vmem:[%s41_s0] sm:$0xf] }
   0x2   :  { %10 = vst [vmem:[%s40_s1 + $0x2] sm:$0xf] %v9_v1 }

</bundles_post_ra>
